<compile_context>
chip_gen: v5e
topology: v5e:2x2
jax: 0.10.0
libtpu: 0.0.40
codegen_flags: <defaults>
</compile_context>

<pallas_src>
import math
from functools import partial

import jax
import jax.numpy as jnp
from jax import lax
from jax.experimental import pallas as pl
from jax.experimental.pallas import tpu as pltpu


def _round_up(x: int, m: int) -> int:
    return ((x + m - 1) // m) * m


def _tpu_hints():
    """(vmem_capacity_bytes, nsem_target) for the attached TPU generation."""
    vmem_cap = 128 * 1024 * 1024
    try:
        info = pltpu.get_tpu_info()
        vmem_cap = int(getattr(info, "vmem_capacity_bytes", vmem_cap))
    except Exception:
        pass
    kind = ""
    try:
        kind = jax.devices()[0].device_kind.lower()
    except Exception:
        pass
    if "v7" in kind or "tpu7" in kind:
        # 64 MiB VMEM per TensorCore; 3.2 TB/s HBM needs deeper outstanding DMAs.
        vmem_cap = min(vmem_cap, 64 * 1024 * 1024)
        nsem_target = 64
    elif "v6" in kind:
        nsem_target = 64
    else:  # v5e and unknown
        nsem_target = 32
    return vmem_cap, nsem_target


def _vmem_limit_bytes(need: int, vmem_cap: int) -> int:
    hi = max(16 << 20, vmem_cap - (16 << 20))       # leave headroom below physical
    return int(min(hi, max(32 << 20, need + (8 << 20))))


# ---------------------------------------------------------------------------
# Path 1: small tables.  MXU one-hot gather, chunked over the vocab axis so the
# (bn, Vk) one-hot / iota intermediates stay small (no vreg spill storms).
# ---------------------------------------------------------------------------
def _embed_onehot_kernel(idx_ref, w_ref, out_ref, acc_ref, *, v_chunk):
    # idx_ref : VMEM int32[(bn, 1)]       -- token ids for this output block
    # w_ref   : VMEM w.dtype[(Vp, Dp)]    -- resident (padded) table
    # out_ref : VMEM w.dtype[(bn, Dp)]    -- lane-dense output block (Dp % 128 == 0)
    # acc_ref : VMEM f32[(bn, Dp)]        -- accumulator scratch
    bn = out_ref.shape[0]
    vp = w_ref.shape[0]
    nk = vp // v_chunk
    ids = idx_ref[...]                                            # (bn, 1)

    def chunk_dot(k0):
        iota = lax.broadcasted_iota(jnp.int32, (bn, v_chunk), 1)  # (bn, Vk)
        onehot = ((ids - k0) == iota).astype(w_ref.dtype)         # (bn, Vk)
        return jnp.dot(onehot, w_ref[pl.ds(k0, v_chunk), :],
                       preferred_element_type=jnp.float32)        # (bn, Dp) f32

    if nk == 1:
        out_ref[...] = chunk_dot(0).astype(out_ref.dtype)
    else:
        acc_ref[...] = jnp.zeros_like(acc_ref)

        def body(k, carry):
            k0 = pl.multiple_of(k * v_chunk, v_chunk)
            acc_ref[...] += chunk_dot(k0)
            return carry

        lax.fori_loop(0, nk, body, 0)
        out_ref[...] = acc_ref[...].astype(out_ref.dtype)


# ---------------------------------------------------------------------------
# Path 2: general path.  Table stays in HBM; per-row async DMA gather into the
# pipelined VMEM output block with up to `nsem` copies in flight.
# ---------------------------------------------------------------------------
def _embed_gather_kernel(idx_ref, w_hbm_ref, out_ref, sem, *, block_n, nsem):
    # idx_ref   : SMEM int32[(chunk,)]       -- scalar-prefetched token ids
    # w_hbm_ref : ANY  w.dtype[(V, D)]       -- embedding table, stays in HBM
    # out_ref   : VMEM w.dtype[(block_n, D)] -- output block for this grid step
    # sem       : DMA semaphores [(nsem,)]   -- nsem is a power of two, <= block_n
    i = pl.program_id(0)
    base = i * block_n

    def make_copy(r, slot):
        tok = idx_ref[base + r]               # SMEM scalar read (issued before waits)
        return pltpu.make_async_copy(
            w_hbm_ref.at[pl.ds(tok, 1), :],   # one HBM row
            out_ref.at[pl.ds(r, 1), :],       # one VMEM row
            sem.at[slot],
        )

    def wait_slot(slot):
        # Dummy (size-only) descriptor: a DMA-semaphore wait just needs the byte
        # count, so no SMEM id re-read / dynamic address math on the wait path.
        pltpu.make_async_copy(
            w_hbm_ref.at[pl.ds(0, 1), :],
            out_ref.at[pl.ds(0, 1), :],
            sem.at[slot],
        ).wait()

    # Prologue: fill the pipe, no waits (static rows/slots).
    for r in range(nsem):
        make_copy(r, r).start()

    # Steady state: read the id and build row r's descriptor BEFORE retiring the
    # copy that used this slot nsem rows earlier (no per-iteration pl.when, and
    # the .wait() doesn't stall the SMEM scalar stream); unrolled for the LLO
    # scheduler to pipeline descriptor issue.
    if block_n > nsem:
        def steady(r, carry):
            slot = r & (nsem - 1)
            cp = make_copy(r, slot)
            wait_slot(slot)
            cp.start()
            return carry

        lax.fori_loop(nsem, block_n, steady, 0, unroll=8)

    # Drain: each slot has exactly one outstanding copy left; all manual DMAs
    # must retire before the pipeline writes this output block back to HBM.
    for slot in range(nsem):
        wait_slot(slot)


# ---------------------------------------------------------------------------
# pallas_call builders
# ---------------------------------------------------------------------------
def _onehot_call(w_pad, idx_col, *, bn, v_chunk, vmem_limit, single_buffer_table):
    vp, dp = w_pad.shape
    n_pad = idx_col.shape[0]
    table_kwargs = {"pipeline_mode": pl.Buffered(1)} if single_buffer_table else {}
    kernel = partial(_embed_onehot_kernel, v_chunk=v_chunk)
    return pl.pallas_call(
        kernel,
        out_shape=jax.ShapeDtypeStruct((n_pad, dp), w_pad.dtype),
        grid_spec=pltpu.PrefetchScalarGridSpec(
            num_scalar_prefetch=0,
            grid=(n_pad // bn,),
            in_specs=[
                pl.BlockSpec((bn, 1), lambda i: (i, 0)),
                # Constant index_map: the table block is resident across steps
                # (single-buffered so it only costs 1x its size in VMEM).
                pl.BlockSpec((vp, dp), lambda i: (0, 0), **table_kwargs),
            ],
            out_specs=pl.BlockSpec((bn, dp), lambda i: (i, 0)),
            scratch_shapes=[pltpu.VMEM((bn, dp), jnp.float32)],
        ),
        compiler_params=pltpu.CompilerParams(
            dimension_semantics=("parallel",),
            vmem_limit_bytes=vmem_limit,
        ),
    )(idx_col, w_pad)


def _dma_call(weight, idx_chunk, *, bn, nsem, vmem_limit):
    V, D = weight.shape
    n_chunk = idx_chunk.shape[0]
    itemsize = jnp.dtype(weight.dtype).itemsize
    kernel = partial(_embed_gather_kernel, block_n=bn, nsem=nsem)
    return pl.pallas_call(
        kernel,
        out_shape=jax.ShapeDtypeStruct((n_chunk, D), weight.dtype),
        grid_spec=pltpu.PrefetchScalarGridSpec(
            num_scalar_prefetch=1,
            grid=(n_chunk // bn,),
            in_specs=[pl.BlockSpec(memory_space=pl.ANY)],     # table stays in HBM
            out_specs=pl.BlockSpec((bn, D), lambda i, idx: (i, 0)),
            scratch_shapes=[pltpu.SemaphoreType.DMA((nsem,))],
        ),
        compiler_params=pltpu.CompilerParams(
            dimension_semantics=("parallel",),
            vmem_limit_bytes=vmem_limit,
        ),
        cost_estimate=pl.CostEstimate(
            flops=0, transcendentals=0,
            bytes_accessed=2 * n_chunk * D * itemsize + 4 * n_chunk),
    )(idx_chunk, weight)


# ---------------------------------------------------------------------------
# Wrapper: output[..., :] = weight[input[...], :]
# ---------------------------------------------------------------------------
def embedding_lookup(weight: jax.Array, indices: jax.Array, *,
                     block_n: int = 256, method: str = "auto") -> jax.Array:
    V, D = weight.shape
    idx_shape = indices.shape
    out_dtype = weight.dtype
    itemsize = jnp.dtype(weight.dtype).itemsize

    flat_idx = indices.reshape(-1).astype(jnp.int32)
    # torch raises on out-of-range ids; a TPU OOB gather/DMA is unchecked, so
    # clamp defensively (documented deviation for invalid inputs).
    flat_idx = jnp.clip(flat_idx, 0, V - 1)
    n = flat_idx.shape[0]
    if n == 0:
        return jnp.zeros(idx_shape + (D,), dtype=out_dtype)

    vmem_cap, nsem_target = _tpu_hints()

    row_align = max(8, 32 // max(itemsize, 1))       # sublane tile for this dtype
    d_pad = _round_up(D, 128)                        # lane-dense output / MXU N dim
    v_chunk = min(512, _round_up(V, 8))
    v_pad = _round_up(V, v_chunk)
    row_bytes = D * itemsize
    table_bytes = v_pad * d_pad * itemsize           # single-buffered resident table

    if method == "auto":
        table_budget = (vmem_cap * 3) // 8           # ~24 MiB v7x, ~48 MiB v5e/v6e
        use_onehot = (table_bytes <= table_budget) and (row_bytes < 1024 or V <= 4096)
        method = "onehot" if use_onehot else "dma"

    # Rows per grid step: amortize grid overhead, keep out block <= ~4 MiB/buffer.
    width_bytes = (d_pad if method == "onehot" else D) * itemsize
    bn = min(block_n, _round_up(n, row_align))
    max_rows = max(row_align,
                   ((4 << 20) // max(width_bytes, 1)) // row_align * row_align)
    bn = max(row_align, min(_round_up(bn, row_align), max_rows))
    n_pad = _round_up(n, bn)
    if n_pad != n:
        flat_idx = jnp.concatenate(
            [flat_idx, jnp.zeros((n_pad - n,), jnp.int32)], axis=0)

    if method == "onehot":
        w_pad = weight
        if (v_pad, d_pad) != (V, D):
            w_pad = jnp.pad(weight, ((0, v_pad - V), (0, d_pad - D)))
        idx_col = flat_idx.reshape(n_pad, 1)

        def run(single_buffer):
            table_bufs = 1 if single_buffer else 2
            need = (table_bufs * table_bytes
                    + 2 * bn * d_pad * itemsize          # double-buffered out block
                    + bn * d_pad * 4                     # f32 accumulator scratch
                    + bn * v_chunk * (4 + itemsize)      # iota + one-hot intermediates
                    + (1 << 20))
            return _onehot_call(w_pad, idx_col, bn=bn, v_chunk=v_chunk,
                                vmem_limit=_vmem_limit_bytes(need, vmem_cap),
                                single_buffer_table=single_buffer)

        try:
            out = run(True)
        except Exception:
            # TODO(synk): pl.Buffered(1) single-buffering rejected by this jax/Mosaic
            # version; fall back to the default double-buffered resident table.
            out = run(False)
        return out[:n, :D].reshape(idx_shape + (D,))

    if method != "dma":
        raise ValueError(f"unknown method: {method!r}")

    nsem = min(nsem_target, bn)
    nsem = 1 << (nsem.bit_length() - 1)              # power of 2 -> slot = r & (nsem-1)
    vmem_limit = _vmem_limit_bytes(2 * bn * D * itemsize + (2 << 20), vmem_cap)
    # Scalar-prefetched ids live in SMEM; chunk the call so each chunk's id array
    # stays <= 128 KiB of SMEM (avoids the next_pow2 SMEM-padding blowup).
    chunk_tokens = max(bn, (32768 // bn) * bn)
    outs = []
    for s in range(0, n_pad, chunk_tokens):
        e = min(s + chunk_tokens, n_pad)
        outs.append(_dma_call(weight, flat_idx[s:e], bn=bn, nsem=nsem,
                              vmem_limit=vmem_limit))
    out = outs[0] if len(outs) == 1 else jnp.concatenate(outs, axis=0)
    return out[:n].reshape(idx_shape + (D,))


def make_embedding_weight(key, n_embeddings: int, embedding_size: int, dtype=jnp.float32):
    """Replicates the module's default initializer:
    uniform(-a, a), a = sqrt(3) / sqrt(embedding_size[0])."""
    std = 1.0 / math.sqrt(embedding_size)
    a = math.sqrt(3.0) * std
    return jax.random.uniform(
        key, (n_embeddings, embedding_size), dtype=dtype, minval=-a, maxval=a
    )


if __name__ == "__main__":
    key = jax.random.PRNGKey(0)
    k1, k2, k3, k4 = jax.random.split(key, 4)

    # Case 1: tiny table matching the module demo: vocab=16, D=32, idx (2, 8).
    V1, D1 = 16, 32
    w1 = make_embedding_weight(k1, V1, D1)
    idx1 = jax.random.randint(k2, (2, 8), 0, V1, dtype=jnp.int32)
    ref1 = w1[idx1]
    for m in ("auto", "onehot", "dma"):
        out1 = jax.block_until_ready(embedding_lookup(w1, idx1, method=m))
        assert out1.shape == (2, 8, D1), out1.shape
        assert out1.dtype == w1.dtype
        assert jnp.allclose(out1, ref1), f"mismatch ({m}) vs reference gather (case 1)"

    # Case 2: bigger vocab, multiple grid blocks, ragged (padded) row count.
    V2, D2 = 512, 128
    w2 = make_embedding_weight(k3, V2, D2)
    idx2 = jax.random.randint(k4, (3, 100), 0, V2, dtype=jnp.int32)
    ref2 = w2[idx2]
    for m in ("auto", "onehot", "dma"):
        out2 = jax.block_until_ready(embedding_lookup(w2, idx2, method=m))
        assert out2.shape == (3, 100, D2), out2.shape
        assert jnp.allclose(out2, ref2), f"mismatch ({m}) vs reference gather (case 2)"

    print("KERNEL_OK")
</pallas_src>

<mosaic_0001>
module attributes {stable_mosaic.version = 11 : i64} {
  func.func @_embed_onehot_kernel(%arg0: i32, %arg1: memref<16x1xi32, #tpu.memory_space<vmem>>, %arg2: memref<16x128xf32, #tpu.memory_space<vmem>>, %arg3: memref<16x128xf32, #tpu.memory_space<vmem>>, %arg4: memref<16x128xf32, #tpu.memory_space<vmem>>) attributes {dimension_semantics = [#tpu.dimension_semantics<parallel>], iteration_bounds = array<i64: 1>, scalar_prefetch = 0 : i64, scratch_operands = 1 : i64, tpu.core_type = #tpu.core_type<tc>, window_params = [{transform_indices = @transform_0, window_bounds = array<i64: 16, 1>}, {pipeline_mode = #tpu.pipeline_mode<synchronous>, transform_indices = @transform_1, window_bounds = array<i64: 16, 128>}, {transform_indices = @transform_2, window_bounds = array<i64: 16, 128>}]} {
    %c0 = arith.constant 0 : index
    %c0_0 = arith.constant 0 : index
    %0 = vector.load %arg1[%c0, %c0_0] : memref<16x1xi32, #tpu.memory_space<vmem>>, vector<16x1xi32>
    %1 = tpu.iota {dimensions = array<i32: 1>} : vector<16x16xi32>
    %c0_i32 = arith.constant 0 : i32
    %2 = vector.broadcast %c0_i32 : i32 to vector<16x1xi32>
    %3 = arith.subi %0, %2 : vector<16x1xi32>
    %4 = vector.broadcast %3 : vector<16x1xi32> to vector<16x16xi32>
    %5 = arith.cmpi eq, %4, %1 : vector<16x16xi32>
    %6 = arith.extui %5 : vector<16x16xi1> to vector<16x16xi32>
    %7 = arith.sitofp %6 : vector<16x16xi32> to vector<16x16xf32>
    %c0_1 = arith.constant 0 : index
    %c0_2 = arith.constant 0 : index
    %8 = vector.load %arg2[%c0_1, %c0_2] : memref<16x128xf32, #tpu.memory_space<vmem>>, vector<16x128xf32>
    %cst = arith.constant dense<0.000000e+00> : vector<16x128xf32>
    %9 = tpu.matmul %7, %8, %cst {dimension_numbers = #tpu.dot_dimension_numbers<[1], [0], [0], [1], [0, 0, 1, 1], [], []>} : vector<16x16xf32>, vector<16x128xf32>, vector<16x128xf32> -> vector<16x128xf32>
    %c0_3 = arith.constant 0 : index
    %c0_4 = arith.constant 0 : index
    %10 = vector.load %arg3[%c0_3, %c0_4] : memref<16x128xf32, #tpu.memory_space<vmem>>, vector<16x128xf32>
    tpu.vector_store %arg3[%c0_3, %c0_4], %9 {strides = array<i32>} : memref<16x128xf32, #tpu.memory_space<vmem>>, vector<16x128xf32>,
    return
  }
  func.func @transform_0(%arg0: i32) -> (i32, i32) {
    %c0_i32 = arith.constant 0 : i32
    %c0_i32_0 = arith.constant 0 : i32
    return %arg0, %c0_i32 : i32, i32
  }
  func.func @transform_1(%arg0: i32) -> (i32, i32) {
    %c0_i32 = arith.constant 0 : i32
    %c0_i32_0 = arith.constant 0 : i32
    %c0_i32_1 = arith.constant 0 : i32
    return %c0_i32, %c0_i32_0 : i32, i32
  }
  func.func @transform_2(%arg0: i32) -> (i32, i32) {
    %c0_i32 = arith.constant 0 : i32
    %c0_i32_0 = arith.constant 0 : i32
    return %arg0, %c0_i32 : i32, i32
  }
}

module attributes {stable_mosaic.version = 11 : i64} {
  func.func @_embed_onehot_kernel(%arg0: i32, %arg1: memref<16x1xi32, #tpu.memory_space<vmem>>, %arg2: memref<16x128xf32, #tpu.memory_space<vmem>>, %arg3: memref<16x128xf32, #tpu.memory_space<vmem>>, %arg4: memref<16x128xf32, #tpu.memory_space<vmem>>) attributes {dimension_semantics = [#tpu.dimension_semantics<parallel>], iteration_bounds = array<i64: 1>, scalar_prefetch = 0 : i64, scratch_operands = 1 : i64, tpu.core_type = #tpu.core_type<tc>, window_params = [{transform_indices = @transform_0, window_bounds = array<i64: 16, 1>}, {pipeline_mode = #tpu.pipeline_mode<synchronous>, transform_indices = @transform_1, window_bounds = array<i64: 16, 128>}, {transform_indices = @transform_2, window_bounds = array<i64: 16, 128>}]} {
    %c0 = arith.constant 0 : index
    %c0_0 = arith.constant 0 : index
    %0 = vector.load %arg1[%c0, %c0_0] : memref<16x1xi32, #tpu.memory_space<vmem>>, vector<16x1xi32>
    %1 = tpu.iota {dimensions = array<i32: 1>} : vector<16x16xi32>
    %c0_i32 = arith.constant 0 : i32
    %2 = vector.broadcast %c0_i32 : i32 to vector<16x1xi32>
    %3 = arith.subi %0, %2 : vector<16x1xi32>
    %4 = vector.broadcast %3 : vector<16x1xi32> to vector<16x16xi32>
    %5 = arith.cmpi eq, %4, %1 : vector<16x16xi32>
    %6 = arith.extui %5 : vector<16x16xi1> to vector<16x16xi32>
    %7 = arith.sitofp %6 : vector<16x16xi32> to vector<16x16xf32>
    %c0_1 = arith.constant 0 : index
    %c0_2 = arith.constant 0 : index
    %8 = vector.load %arg2[%c0_1, %c0_2] : memref<16x128xf32, #tpu.memory_space<vmem>>, vector<16x128xf32>
    %cst = arith.constant dense<0.000000e+00> : vector<16x128xf32>
    %9 = tpu.matmul %7, %8, %cst {dimension_numbers = #tpu.dot_dimension_numbers<[1], [0], [0], [1], [0, 0, 1, 1], [], []>} : vector<16x16xf32>, vector<16x128xf32>, vector<16x128xf32> -> vector<16x128xf32>
    %c0_3 = arith.constant 0 : index
    %c0_4 = arith.constant 0 : index
    %10 = vector.load %arg3[%c0_3, %c0_4] : memref<16x128xf32, #tpu.memory_space<vmem>>, vector<16x128xf32>
    tpu.vector_store %arg3[%c0_3, %c0_4], %9 {strides = array<i32>} : memref<16x128xf32, #tpu.memory_space<vmem>>, vector<16x128xf32>,
    return
  }
  func.func @transform_0(%arg0: i32) -> (i32, i32) {
    %c0_i32 = arith.constant 0 : i32
    %c0_i32_0 = arith.constant 0 : i32
    return %arg0, %c0_i32 : i32, i32
  }
  func.func @transform_1(%arg0: i32) -> (i32, i32) {
    %c0_i32 = arith.constant 0 : i32
    %c0_i32_0 = arith.constant 0 : i32
    %c0_i32_1 = arith.constant 0 : i32
    return %c0_i32, %c0_i32_0 : i32, i32
  }
  func.func @transform_2(%arg0: i32) -> (i32, i32) {
    %c0_i32 = arith.constant 0 : i32
    %c0_i32_0 = arith.constant 0 : i32
    return %arg0, %c0_i32 : i32, i32
  }
}

</mosaic_0001>

<bundles_post_ra>
// kernel: tpu_custom_call.1
= control target key start
LH: loop header
LB: loop body
LE: loop exit
PB: predicated region body
PF: predicated region fallthrough
CT: control target
= control target key end

     0   :  { %v118_v2 = vmov 0   ;;  %s153_s0 = inlined_call_operand.vmem [shape: s32[16,1], index: 0, kind: input, shape index: {}]   ;;  %s154_s1 = inlined_call_operand.vmem [shape: f32[16,128], index: 1, kind: input, shape index: {}]   ;;  %s155_s2 = inlined_call_operand.hbm [shape: f32[16,128], index: 2, kind: output, shape index: {}]  }
   0x1   :  { %v12_v0 = vld [vmem:[%s153_s0] sm:$0xff]  ;;  %v29_v1 = vld [vmem:[%s154_s1 + $0x8] sm:$0xff]  ;;  %91 = vset.pattern.permute.xlu0 %v118_v2 }
   0x2   :  { %51 = vmatpush.msra.mxu0 %v29_v1 }
   0x3   :  { %7 = vsyncpa [#allocation4], 0  ;;  %17 = vperm.xlu0 %91, %v12_v0   ;;  %84 = vmatpush.msra.mxu1 %v29_v1  ;;  %v13_v3 = vld [vmem:[%s153_s0 + $0x8] sm:$0xff]  ;;  %v28_v4 = vld [vmem:[%s154_s1] sm:$0xff]  ;;  %v14_v5 = vlaneseq  ;;  %vm30_vm0 = vcmask 130048   ;;  %v119_v8 = vmov 0.0  }
   0x4   :  { %52 = vmatpush.msra.mxu0 %v28_v4  ;;  %s120_s0 = smov [#allocation3]   ;;  %s68_s19 = sshll.u32 %s155_s2, 4  ;;  %s69_s19 = int_to_ptr.hbm [resolvable:$true] %s68_s19 }
   0x5   :  { %85 = vmatpush.msra.mxu1 %v28_v4  ;;  %v15_v6 = vand.u32 127, %v14_v5  ;;  %s66_s17 = sshll.u32 %s120_s0, 4  ;;  %s121_s20 = smov 128   ;;  %s67_s17 = int_to_ptr.vmem [resolvable:$true] %s66_s17 }
   0x6   :  { %s122_s21 = smov 8  }
   0xb   :  { %20 = vperm.xlu0 %91, %v13_v3  }
  0x75   :  { %v18_v7 = vpop.permute.xlu0 %17 }
  0x76   :  { %vm22_vm1 = vcmp.eq.s32.totalorder %v18_v7, %v15_v6 }
  0x77   :  { %v80_v9 = vsel %vm22_vm1, 1.0, %v119_v8 }
  0x78   :  { %82 = vmatmul.msk.f32.vlgmr.msra.gmra.mxu0 %vm30_vm0, %v80_v9 }
  0x7d   :  { %v21_v10 = vpop.permute.xlu0 %20 }
  0x7e   :  { %vm23_vm2 = vcmp.eq.s32.totalorder %v21_v10, %v15_v6 }
  0x7f   :  { %v81_v11 = vsel %vm23_vm2, 1.0, %v119_v8 }
  0x80   :  { %83 = vmatmul.msk.f32.vlgmr.msra.gmra.mxu1 %vm30_vm0, %v81_v11 }
  0xf5   :  { %v54_v12 = vpop.f32.mrf.mxu0 }
  0xf6   :  { %60 = vst [vmem:[#allocation3] sm:$0xff] %v54_v12 }
  0xfd   :  { %v57_v13 = vpop.f32.mrf.mxu1 }
  0xfe   :  { %61 = vst [vmem:[#allocation3 + $0x8] sm:$0xff] %v57_v13 }
  0xff   :  { %74 = dma.vmem_to_hbm [thread:$0]  %s67_s17, 256, %s69_s19, [#allocation4], %s121_s20, %s121_s20, %s122_s21  }
 0x100   :  { %116 = dma.done.wait [#allocation4], 256  }
 0x101   :  { %117 = vsyncadd [#allocation4], 4294967040 }
 0x102   :  { %79 = vsyncpa [#allocation4], 1 }

// kernel: tpu_custom_call.1
= control target key start
LH: loop header
LB: loop body
LE: loop exit
PB: predicated region body
PF: predicated region fallthrough
CT: control target
= control target key end

     0   :  { %v118_v2 = vmov 0   ;;  %s153_s0 = inlined_call_operand.vmem [shape: s32[16,1], index: 0, kind: input, shape index: {}]   ;;  %s154_s1 = inlined_call_operand.vmem [shape: f32[16,128], index: 1, kind: input, shape index: {}]   ;;  %s155_s2 = inlined_call_operand.hbm [shape: f32[16,128], index: 2, kind: output, shape index: {}]  }
   0x1   :  { %v12_v0 = vld [vmem:[%s153_s0] sm:$0xff]  ;;  %v29_v1 = vld [vmem:[%s154_s1 + $0x8] sm:$0xff]  ;;  %91 = vset.pattern.permute.xlu0 %v118_v2 }
   0x2   :  { %51 = vmatpush.msra.mxu0 %v29_v1 }
   0x3   :  { %7 = vsyncpa [#allocation4], 0  ;;  %17 = vperm.xlu0 %91, %v12_v0   ;;  %84 = vmatpush.msra.mxu1 %v29_v1  ;;  %v13_v3 = vld [vmem:[%s153_s0 + $0x8] sm:$0xff]  ;;  %v28_v4 = vld [vmem:[%s154_s1] sm:$0xff]  ;;  %v14_v5 = vlaneseq  ;;  %vm30_vm0 = vcmask 130048   ;;  %v119_v8 = vmov 0.0  }
   0x4   :  { %52 = vmatpush.msra.mxu0 %v28_v4  ;;  %s120_s0 = smov [#allocation3]   ;;  %s68_s19 = sshll.u32 %s155_s2, 4  ;;  %s69_s19 = int_to_ptr.hbm [resolvable:$true] %s68_s19 }
   0x5   :  { %85 = vmatpush.msra.mxu1 %v28_v4  ;;  %v15_v6 = vand.u32 127, %v14_v5  ;;  %s66_s17 = sshll.u32 %s120_s0, 4  ;;  %s121_s20 = smov 128   ;;  %s67_s17 = int_to_ptr.vmem [resolvable:$true] %s66_s17 }
   0x6   :  { %s122_s21 = smov 8  }
   0xb   :  { %20 = vperm.xlu0 %91, %v13_v3  }
  0x75   :  { %v18_v7 = vpop.permute.xlu0 %17 }
  0x76   :  { %vm22_vm1 = vcmp.eq.s32.totalorder %v18_v7, %v15_v6 }
  0x77   :  { %v80_v9 = vsel %vm22_vm1, 1.0, %v119_v8 }
  0x78   :  { %82 = vmatmul.msk.f32.vlgmr.msra.gmra.mxu0 %vm30_vm0, %v80_v9 }
  0x7d   :  { %v21_v10 = vpop.permute.xlu0 %20 }
  0x7e   :  { %vm23_vm2 = vcmp.eq.s32.totalorder %v21_v10, %v15_v6 }
  0x7f   :  { %v81_v11 = vsel %vm23_vm2, 1.0, %v119_v8 }
  0x80   :  { %83 = vmatmul.msk.f32.vlgmr.msra.gmra.mxu1 %vm30_vm0, %v81_v11 }
  0xf5   :  { %v54_v12 = vpop.f32.mrf.mxu0 }
  0xf6   :  { %60 = vst [vmem:[#allocation3] sm:$0xff] %v54_v12 }
  0xfd   :  { %v57_v13 = vpop.f32.mrf.mxu1 }
  0xfe   :  { %61 = vst [vmem:[#allocation3 + $0x8] sm:$0xff] %v57_v13 }
  0xff   :  { %74 = dma.vmem_to_hbm [thread:$0]  %s67_s17, 256, %s69_s19, [#allocation4], %s121_s20, %s121_s20, %s122_s21  }
 0x100   :  { %116 = dma.done.wait [#allocation4], 256  }
 0x101   :  { %117 = vsyncadd [#allocation4], 4294967040 }
 0x102   :  { %79 = vsyncpa [#allocation4], 1 }

</bundles_post_ra>
